<compile_context>
chip_gen: v5e
topology: v5e:2x2
jax: 0.10.0
libtpu: 0.0.40
codegen_flags: <defaults>
</compile_context>

<pallas_src>
import jax
import jax.numpy as jnp
from jax import lax
from jax.experimental import pallas as pl
from jax.experimental.pallas import tpu as pltpu


# ----------------------------- Pallas kernel -------------------------------

def _moe_expert_kernel(flags_ref,   # SMEM (n_t*E,) int32  (scalar prefetch)
                       fetch_ref,   # SMEM (n_t*E,) int32  (scalar prefetch)
                       x_ref,       # (tT, H)      compute dtype
                       rw_ref,      # (tT, E)      f32 dense routing weights
                       w13_ref,     # (1, 2*tF, H) compute dtype, rows=[w1_f;w3_f]
                       w2_ref,      # (1, tF, H)   compute dtype (pre-transposed)
                       out_ref,     # (tT, H)      output dtype
                       acc_ref,     # (tT, H)      f32 accumulator scratch
                       rwe_ref):    # (tT, 1)      f32 routing-weight scratch
    t = pl.program_id(0)
    e = pl.program_id(1)
    f = pl.program_id(2)
    n_e = pl.num_programs(1)
    n_f = pl.num_programs(2)
    tF = w2_ref.shape[1]

    # Zero the resident f32 accumulator at the start of each token tile sweep.
    @pl.when(jnp.logical_and(e == 0, f == 0))
    def _():
        acc_ref[...] = jnp.zeros_like(acc_ref)

    # Per-(token tile, expert) routing weight column — hoisted out of the F
    # loop (computed once per (t, e) instead of n_f times).
    @pl.when(f == 0)
    def _():
        rw = rw_ref[...]                                           # (tT, E)
        col = lax.broadcasted_iota(jnp.int32, rw.shape, 1)
        rwe_ref[...] = jnp.sum(jnp.where(col == e, rw, 0.0), axis=1,
                               keepdims=True)                      # (tT, 1)

    # Skip FLOPs for experts with no routed token in this tile.  Their weight
    # DMAs are also elided because the w13/w2 index_maps freeze the block
    # index when the flag is 0 (see phi_moe_forward).
    @pl.when(flags_ref[t * n_e + e] > 0)
    def _():
        x = x_ref[...]                         # (tT, H)
        w13 = w13_ref[0]                       # (2*tF, H): [w1 F-chunk; w3 F-chunk]
        w2 = w2_ref[0]                         # (tF, H)

        # One fused dot for w1 and w3: contract over H (last dim of both).
        dn_h = (((1,), (1,)), ((), ()))
        h = lax.dot_general(x, w13, dn_h,
                            preferred_element_type=jnp.float32)   # (tT, 2*tF)
        h1 = h[:, :tF]
        h3 = h[:, tF:]

        # SwiGLU in f32, pre-scaled by the per-token routing weight.
        inter = (h1 * jax.nn.sigmoid(h1)) * h3 * rwe_ref[...]

        # Canonical (M,K)x(K,N) contraction against the (tF, H) w2 tile.
        dn_f = (((1,), (0,)), ((), ()))
        acc_ref[...] += lax.dot_general(inter.astype(x.dtype), w2, dn_f,
                                        preferred_element_type=jnp.float32)

    # Final (expert, F) step for this token tile: cast once and write out.
    @pl.when(jnp.logical_and(e == n_e - 1, f == n_f - 1))
    def _():
        out_ref[...] = acc_ref[...].astype(out_ref.dtype)


# ------------------------------ routing glue -------------------------------

def masked_sampling_omp_inference(scores, jitter_eps):
    """Faithful port of the PyTorch masked_sampling_omp_inference (top_k=2)."""
    _, E = scores.shape
    top_vals, top_idx = jax.lax.top_k(scores, 2)                 # (T, 2)

    # --- multiplier 1 ---
    t1 = top_vals[:, 0:1]
    factor = jnp.maximum(jnp.abs(scores), t1)                    # clamp(min=t1)
    factor = jnp.where(factor == 0.0, 1.0, factor)               # guard 0/0->NaN
    mask1 = (t1 - scores) / factor > 2.0 * jitter_eps
    sm1 = jax.nn.softmax(jnp.where(mask1, -jnp.inf, scores), axis=-1)
    mult1 = jnp.take_along_axis(sm1, top_idx[:, 0:1], axis=-1)

    # --- multiplier 2 ---
    t2 = top_vals[:, 1:2]
    factor = jnp.maximum(jnp.abs(scores), t2)
    factor = jnp.where(factor == 0.0, 1.0, factor)
    mask2 = (t2 - scores) / factor > 2.0 * jitter_eps
    col = jnp.arange(E)[None, :]
    scores_scat = jnp.where(col == top_idx[:, 0:1], -jnp.inf, scores)
    sm2 = jax.nn.softmax(jnp.where(mask2, -jnp.inf, scores_scat), axis=-1)
    mult2 = jnp.take_along_axis(sm2, top_idx[:, 1:2], axis=-1)

    multiplier = jnp.concatenate([mult1, mult2], axis=-1)        # (T, 2)
    return multiplier, top_idx


def _route(x_flat, gate_w, jitter_eps):
    """Gate matmul + masked top-2 routing in f32.  Returns dense (T, E) weights
    that are exactly 0.0 for unselected experts."""
    E = gate_w.shape[0]
    x32 = x_flat.astype(jnp.float32)
    gw32 = gate_w.astype(jnp.float32)
    logits = lax.dot_general(x32, gw32, (((1,), (1,)), ((), ())))   # (T, E)
    routing_weights, selected = masked_sampling_omp_inference(logits, jitter_eps)
    one_hot = jax.nn.one_hot(selected, E, dtype=jnp.float32)        # (T, 2, E)
    rw_dense = jnp.sum(one_hot * routing_weights[..., None], axis=1)
    return rw_dense


# ------------------------------ tiling helpers ------------------------------

def _round_up(x, m):
    return ((x + m - 1) // m) * m


def _choose_tile(dim, cap, align):
    """Largest divisor of `dim` <= cap that is a multiple of `align`; falls
    back to the full dim (always layout-legal)."""
    if dim <= cap:
        return dim
    t = (cap // align) * align
    while t >= align:
        if dim % t == 0:
            return t
        t -= align
    return dim


def _vmem_estimate(tT, tF, H, E, w_itm, x_itm, out_itm):
    """Rough VMEM footprint: double-buffered blocks + resident scratches."""
    return (2 * tT * H * x_itm            # x tile
            + 2 * tT * E * 4              # routing-weight tile
            + 2 * 2 * tF * H * w_itm      # fused [w1|w3] tile
            + 2 * tF * H * w_itm          # w2 tile
            + 2 * tT * H * out_itm        # output tile
            + tT * H * 4                  # f32 accumulator scratch
            + tT * 512)                   # (tT,1) f32 scratch (lane padded)


def _vmem_capacity_bytes():
    try:
        return int(pltpu.get_tpu_info().vmem_capacity_bytes)
    except Exception:
        return 64 * 1024 * 1024           # conservative fallback (v7x per-TC)


# ------------------------------ weight prep --------------------------------

def prepare_expert_weights(w1, w2, w3, f_tile, compute_dtype):
    """One-time weight re-layout (hoist to model init in real use):
      * w1/w3 fused + interleaved per F-tile -> (E, 2F, H) so one BlockSpec
        streams both with contiguous rows and a single first-stage dot,
      * w2 transposed to (E, F, H) so its tile DMA is row-contiguous and the
        second matmul is a canonical (M,K)x(K,N) contraction."""
    E, F, H = w1.shape
    n_f = F // f_tile
    w13 = jnp.concatenate(
        [w1.reshape(E, n_f, f_tile, H), w3.reshape(E, n_f, f_tile, H)],
        axis=2).reshape(E, 2 * F, H).astype(compute_dtype)
    w2t = jnp.swapaxes(w2, 1, 2).astype(compute_dtype)             # (E, F, H)
    return w13, w2t


# ------------------------------ full forward -------------------------------

def phi_moe_forward(hidden_states, gate_w, w1, w2, w3, jitter_eps=0.01,
                    compute_dtype=None, token_tile=None, f_tile=None):
    """
    hidden_states: (B, S, H)
    gate_w: (E, H);  w1, w3: (E, F, H);  w2: (E, H, F)   (native PyTorch layouts)
    compute_dtype: dtype for the MXU matmuls (e.g. jnp.bfloat16); accumulation
                   is always f32.  None -> keep the input dtype.
    token_tile / f_tile: optional overrides; by default sized from physical
                   VMEM (big token tiles -> MXU-bound weight streaming).
    """
    B, S, H = hidden_states.shape
    E, F, _ = w1.shape
    T = B * S
    x_flat = hidden_states.reshape(T, H)

    # ---- router (tiny; plain XLA, f32 for stable top-2 / threshold math) ----
    rw_dense = _route(x_flat, gate_w, jitter_eps)                 # (T, E) f32

    cdt = jnp.dtype(compute_dtype) if compute_dtype is not None else x_flat.dtype
    out_dt = hidden_states.dtype
    w_itm = jnp.dtype(cdt).itemsize
    x_itm = w_itm
    out_itm = jnp.dtype(out_dt).itemsize

    # ---- generation-aware tiling from physical VMEM capacity ----
    vmem_cap = _vmem_capacity_bytes()
    budget = int(0.8 * vmem_cap)
    if f_tile is None:
        f_tile = 512 if vmem_cap >= 96 * 2**20 else 256
    tF = _choose_tile(F, f_tile, 128)

    sub = max(8, 32 // x_itm)                 # sublane alignment (16 for bf16)
    cap_tT = token_tile if token_tile is not None else (
        1024 if vmem_cap >= 96 * 2**20 else 768)
    tT = min(_round_up(cap_tT, sub), _round_up(T, sub))
    while tT > sub and _vmem_estimate(tT, tF, H, E, w_itm, x_itm, out_itm) > budget:
        tT = _round_up(max(sub, tT // 2), sub)

    # ---- pad tokens to a multiple of the token tile; padded rows carry zero
    # routing weight and are dropped from the output ----
    T_pad = _round_up(T, tT)
    x_c = x_flat.astype(cdt)
    rw_p = rw_dense
    if T_pad != T:
        x_c = jnp.pad(x_c, ((0, T_pad - T), (0, 0)))
        rw_p = jnp.pad(rw_p, ((0, T_pad - T), (0, 0)))
    n_t = T_pad // tT
    n_f = F // tF

    # ---- one-time weight re-layout (hoist to model init in real use) ----
    w13, w2t = prepare_expert_weights(w1, w2, w3, tF, cdt)

    # ---- scalar-prefetch routing metadata ----
    # flags[t*E+e]  : 1 iff expert e has >=1 routed token in token tile t.
    # fetch_e[t*E+e]: expert index the weight index_maps should point at; for
    #   an inactive (t, e) it repeats the previously fetched expert, so the
    #   block index does not change and Pallas elides the weight DMAs
    #   (pl.when alone would only skip the FLOPs).
    flags = (rw_p.reshape(n_t, tT, E) > 0.0).any(axis=1).reshape(-1)
    flags = flags.astype(jnp.int32)                               # (n_t*E,)
    gidx = jnp.arange(n_t * E, dtype=jnp.int32)
    last_active = lax.cummax(jnp.where(flags > 0, gidx, -1), axis=0)
    fetch_e = jnp.where(last_active >= 0, last_active % E, 0).astype(jnp.int32)
    # TODO(synk): full grouped GEMM (sort tokens by expert + group offsets in
    # the index_map) would also shrink the token dimension per expert.

    est = _vmem_estimate(tT, tF, H, E, w_itm, x_itm, out_itm)
    vmem_limit = int(min(0.9 * vmem_cap, max(2 * est, 32 * 2**20)))

    def _x_map(t, e, f, flg, fe):
        return (t, 0)

    def _w_map(t, e, f, flg, fe):
        g = t * E + e
        active = flg[g]
        # Freeze the block index when inactive -> Pallas skips the DMA.
        f_sel = active * f + (1 - active) * (n_f - 1)
        return (fe[g], f_sel, 0)

    out_flat = pl.pallas_call(
        _moe_expert_kernel,
        grid_spec=pltpu.PrefetchScalarGridSpec(
            num_scalar_prefetch=2,
            grid=(n_t, E, n_f),
            in_specs=[
                pl.BlockSpec((tT, H), _x_map),                    # x
                pl.BlockSpec((tT, E), _x_map),                    # routing wts
                pl.BlockSpec((1, 2 * tF, H), _w_map),             # fused w1|w3
                pl.BlockSpec((1, tF, H), _w_map),                 # w2 (E,F,H)
            ],
            out_specs=pl.BlockSpec((tT, H), _x_map),
            scratch_shapes=[pltpu.VMEM((tT, H), jnp.float32),
                            pltpu.VMEM((tT, 1), jnp.float32)],
        ),
        out_shape=jax.ShapeDtypeStruct((T_pad, H), out_dt),
        compiler_params=pltpu.CompilerParams(
            dimension_semantics=("parallel", "arbitrary", "arbitrary"),
            vmem_limit_bytes=vmem_limit,
        ),
    )(flags, fetch_e, x_c, rw_p, w13, w2t)

    if T_pad != T:
        out_flat = out_flat[:T]
    return out_flat.reshape(B, S, H)


# ------------------------- pure-JAX reference check ------------------------

def phi_moe_reference(hidden_states, gate_w, w1, w2, w3, jitter_eps=0.01):
    B, S, H = hidden_states.shape
    E = gate_w.shape[0]
    x = hidden_states.reshape(-1, H).astype(jnp.float32)
    rw_dense = _route(x, gate_w, jitter_eps)
    out = jnp.zeros_like(x)
    for e in range(E):
        h1 = x @ w1[e].astype(jnp.float32).T
        h3 = x @ w3[e].astype(jnp.float32).T
        inter = jax.nn.silu(h1) * h3
        out = out + (inter @ w2[e].astype(jnp.float32).T) * rw_dense[:, e:e + 1]
    return out.reshape(B, S, H).astype(hidden_states.dtype)


# ---------------------------------- main -----------------------------------

def _make_params(key, E, F, H):
    k_g, k1, k2, k3 = jax.random.split(key, 4)
    gate_w = jax.random.normal(k_g, (E, H), dtype=jnp.float32) * 0.1
    w1 = jax.random.normal(k1, (E, F, H), dtype=jnp.float32) * 0.1
    w2 = jax.random.normal(k2, (E, H, F), dtype=jnp.float32) * 0.1
    w3 = jax.random.normal(k3, (E, F, H), dtype=jnp.float32) * 0.1
    return gate_w, w1, w2, w3


if __name__ == "__main__":
    key = jax.random.PRNGKey(0)
    k_a, k_b, k_c, k_x1, k_x2, k_x3 = jax.random.split(key, 6)
    jitter_eps = 0.01

    # ---- config 1: PhiMoE-style small shapes, single token tile ----
    B1, S1, H1, F1, E1 = 2, 8, 32, 64, 8
    hs1 = jax.random.normal(k_x1, (B1, S1, H1), dtype=jnp.float32)
    g1, w1a, w2a, w3a = _make_params(k_a, E1, F1, H1)
    ref1 = phi_moe_reference(hs1, g1, w1a, w2a, w3a, jitter_eps)

    out1 = jax.block_until_ready(
        phi_moe_forward(hs1, g1, w1a, w2a, w3a, jitter_eps))
    assert out1.shape == (B1, S1, H1)
    assert jnp.allclose(out1, ref1, atol=1e-4, rtol=1e-4), \
        f"f32 max diff {jnp.max(jnp.abs(out1 - ref1))}"

    out1_bf16 = jax.block_until_ready(
        phi_moe_forward(hs1, g1, w1a, w2a, w3a, jitter_eps,
                        compute_dtype=jnp.bfloat16))
    assert jnp.allclose(out1_bf16.astype(jnp.float32), ref1,
                        atol=5e-2, rtol=5e-2), \
        f"bf16 max diff {jnp.max(jnp.abs(out1_bf16 - ref1))}"

    # ---- config 2: multi token tiles + token padding + multiple F tiles ----
    B2, S2, H2, F2, E2 = 2, 12, 128, 256, 4      # T=24 -> padded to 32
    hs2 = jax.random.normal(k_x2, (B2, S2, H2), dtype=jnp.float32)
    g2, w1b, w2b, w3b = _make_params(k_b, E2, F2, H2)
    ref2 = phi_moe_reference(hs2, g2, w1b, w2b, w3b, jitter_eps)
    out2 = jax.block_until_ready(
        phi_moe_forward(hs2, g2, w1b, w2b, w3b, jitter_eps,
                        token_tile=16, f_tile=128))
    assert out2.shape == (B2, S2, H2)
    assert jnp.allclose(out2, ref2, atol=1e-4, rtol=1e-4), \
        f"tiled f32 max diff {jnp.max(jnp.abs(out2 - ref2))}"

    # ---- config 3: tiny tiles with many experts -> exercises inactive-expert
    # flag gating and the frozen-index DMA elision path ----
    B3, S3, H3, F3, E3 = 1, 8, 32, 64, 8
    hs3 = jax.random.normal(k_x3, (B3, S3, H3), dtype=jnp.float32)
    g3, w1c, w2c, w3c = _make_params(k_c, E3, F3, H3)
    ref3 = phi_moe_reference(hs3, g3, w1c, w2c, w3c, jitter_eps)
    out3 = jax.block_until_ready(
        phi_moe_forward(hs3, g3, w1c, w2c, w3c, jitter_eps, token_tile=8))
    assert jnp.allclose(out3, ref3, atol=1e-4, rtol=1e-4), \
        f"sparse f32 max diff {jnp.max(jnp.abs(out3 - ref3))}"

    print("KERNEL_OK")
</pallas_src>

<mosaic_0001>
module attributes {stable_mosaic.version = 11 : i64} {
  func.func @_moe_expert_kernel(%arg0: i32, %arg1: i32, %arg2: i32, %arg3: memref<8xi32, #tpu.memory_space<smem>>, %arg4: memref<8xi32, #tpu.memory_space<smem>>, %arg5: memref<16x32xf32, #tpu.memory_space<vmem>>, %arg6: memref<16x8xf32, #tpu.memory_space<vmem>>, %arg7: memref<1x128x32xf32, #tpu.memory_space<vmem>>, %arg8: memref<1x64x32xf32, #tpu.memory_space<vmem>>, %arg9: memref<16x32xf32, #tpu.memory_space<vmem>>, %arg10: memref<16x32xf32, #tpu.memory_space<vmem>>, %arg11: memref<16x1xf32, #tpu.memory_space<vmem>>) attributes {dimension_semantics = [#tpu.dimension_semantics<parallel>, #tpu.dimension_semantics<arbitrary>, #tpu.dimension_semantics<arbitrary>], iteration_bounds = array<i64: 1, 8, 1>, scalar_prefetch = 2 : i64, scratch_operands = 2 : i64, tpu.core_type = #tpu.core_type<tc>, window_params = [{transform_indices = @transform_0, window_bounds = array<i64: 16, 32>}, {transform_indices = @transform_1, window_bounds = array<i64: 16, 8>}, {transform_indices = @transform_2, window_bounds = array<i64: 1, 128, 32>}, {transform_indices = @transform_3, window_bounds = array<i64: 1, 64, 32>}, {transform_indices = @transform_4, window_bounds = array<i64: 16, 32>}]} {
    %c0_i32 = arith.constant 0 : i32
    %0 = arith.cmpi eq, %arg1, %c0_i32 : i32
    %c0_i32_0 = arith.constant 0 : i32
    %1 = arith.cmpi eq, %arg2, %c0_i32_0 : i32
    %2 = arith.andi %0, %1 : i1
    %3 = arith.extui %2 : i1 to i32
    %c0_i32_1 = arith.constant 0 : i32
    %4 = arith.cmpi ne, %3, %c0_i32_1 : i32
    scf.if %4 {
      %cst = arith.constant 0.000000e+00 : f32
      %20 = vector.broadcast %cst : f32 to vector<16x32xf32>
      %c0 = arith.constant 0 : index
      %c0_8 = arith.constant 0 : index
      %21 = vector.load %arg10[%c0, %c0_8] : memref<16x32xf32, #tpu.memory_space<vmem>>, vector<16x32xf32>
      tpu.vector_store %arg10[%c0, %c0_8], %20 {strides = array<i32>} : memref<16x32xf32, #tpu.memory_space<vmem>>, vector<16x32xf32>,
    } else {
    }
    %c0_i32_2 = arith.constant 0 : i32
    %5 = arith.cmpi eq, %arg2, %c0_i32_2 : i32
    %6 = arith.extui %5 : i1 to i32
    %c0_i32_3 = arith.constant 0 : i32
    %7 = arith.cmpi ne, %6, %c0_i32_3 : i32
    scf.if %7 {
      %c0 = arith.constant 0 : index
      %c0_8 = arith.constant 0 : index
      %20 = vector.load %arg6[%c0, %c0_8] : memref<16x8xf32, #tpu.memory_space<vmem>>, vector<16x8xf32>
      %21 = tpu.iota {dimensions = array<i32: 1>} : vector<16x8xi32>
      %22 = vector.broadcast %arg1 : i32 to vector<16x8xi32>
      %23 = arith.cmpi eq, %21, %22 : vector<16x8xi32>
      %cst = arith.constant 0.000000e+00 : f32
      %24 = vector.broadcast %cst : f32 to vector<16x8xf32>
      %25 = arith.select %23, %20, %24 : vector<16x8xi1>, vector<16x8xf32>
      %cst_9 = arith.constant dense<0.000000e+00> : vector<16xf32>
      %26 = vector.multi_reduction <add>, %25, %cst_9 [1] : vector<16x8xf32> to vector<16xf32>
      %27 = vector.shape_cast %26 : vector<16xf32> to vector<16x1xf32>
      %c0_10 = arith.constant 0 : index
      %c0_11 = arith.constant 0 : index
      %28 = vector.load %arg11[%c0_10, %c0_11] : memref<16x1xf32, #tpu.memory_space<vmem>>, vector<16x1xf32>
      tpu.vector_store %arg11[%c0_10, %c0_11], %27 {strides = array<i32>} : memref<16x1xf32, #tpu.memory_space<vmem>>, vector<16x1xf32>,
    } else {
    }
    %c8_i32 = arith.constant 8 : i32
    %8 = arith.muli %arg0, %c8_i32 : i32
    %9 = arith.addi %8, %arg1 : i32
    %10 = arith.index_cast %9 : i32 to index
    %11 = memref.load %arg3[%10] : memref<8xi32, #tpu.memory_space<smem>>
    %c0_i32_4 = arith.constant 0 : i32
    %12 = arith.cmpi sgt, %11, %c0_i32_4 : i32
    %13 = arith.extui %12 : i1 to i32
    %c0_i32_5 = arith.constant 0 : i32
    %14 = arith.cmpi ne, %13, %c0_i32_5 : i32
    scf.if %14 {
      %c0 = arith.constant 0 : index
      %c0_8 = arith.constant 0 : index
      %20 = vector.load %arg5[%c0, %c0_8] : memref<16x32xf32, #tpu.memory_space<vmem>>, vector<16x32xf32>
      %c0_9 = arith.constant 0 : index
      %c0_10 = arith.constant 0 : index
      %c0_11 = arith.constant 0 : index
      %21 = vector.load %arg7[%c0_9, %c0_10, %c0_11] : memref<1x128x32xf32, #tpu.memory_space<vmem>>, vector<1x128x32xf32>
      %22 = vector.shape_cast %21 : vector<1x128x32xf32> to vector<128x32xf32>
      %c0_12 = arith.constant 0 : index
      %c0_13 = arith.constant 0 : index
      %c0_14 = arith.constant 0 : index
      %23 = vector.load %arg8[%c0_12, %c0_13, %c0_14] : memref<1x64x32xf32, #tpu.memory_space<vmem>>, vector<1x64x32xf32>
      %24 = vector.shape_cast %23 : vector<1x64x32xf32> to vector<64x32xf32>
      %cst = arith.constant dense<0.000000e+00> : vector<16x128xf32>
      %25 = tpu.matmul %20, %22, %cst {dimension_numbers = #tpu.dot_dimension_numbers<[1], [1], [0], [0], [0, 0, 1, 0], [], []>} : vector<16x32xf32>, vector<128x32xf32>, vector<16x128xf32> -> vector<16x128xf32>
      %26 = vector.extract_strided_slice %25 {offsets = [0, 0], sizes = [16, 64], strides = [1, 1]} : vector<16x128xf32> to vector<16x64xf32>
      %27 = vector.extract_strided_slice %25 {offsets = [0, 64], sizes = [16, 64], strides = [1, 1]} : vector<16x128xf32> to vector<16x64xf32>
      %28 = arith.negf %26 : vector<16x64xf32>
      %29 = math.exp %28 : vector<16x64xf32>
      %cst_15 = arith.constant 1.000000e+00 : f32
      %30 = vector.broadcast %cst_15 : f32 to vector<16x64xf32>
      %31 = arith.addf %30, %29 : vector<16x64xf32>
      %32 = arith.divf %30, %31 : vector<16x64xf32>
      %33 = arith.mulf %26, %32 : vector<16x64xf32>
      %34 = arith.mulf %33, %27 : vector<16x64xf32>
      %c0_16 = arith.constant 0 : index
      %c0_17 = arith.constant 0 : index
      %35 = vector.load %arg11[%c0_16, %c0_17] : memref<16x1xf32, #tpu.memory_space<vmem>>, vector<16x1xf32>
      %36 = vector.broadcast %35 : vector<16x1xf32> to vector<16x64xf32>
      %37 = arith.mulf %34, %36 : vector<16x64xf32>
      %c0_18 = arith.constant 0 : index
      %c0_19 = arith.constant 0 : index
      %38 = vector.load %arg10[%c0_18, %c0_19] : memref<16x32xf32, #tpu.memory_space<vmem>>, vector<16x32xf32>
      %cst_20 = arith.constant dense<0.000000e+00> : vector<16x32xf32>
      %39 = tpu.matmul %37, %24, %cst_20 {dimension_numbers = #tpu.dot_dimension_numbers<[1], [0], [0], [1], [0, 0, 1, 1], [], []>} : vector<16x64xf32>, vector<64x32xf32>, vector<16x32xf32> -> vector<16x32xf32>
      %40 = arith.addf %38, %39 : vector<16x32xf32>
      %c0_21 = arith.constant 0 : index
      %c0_22 = arith.constant 0 : index
      %41 = vector.load %arg10[%c0_21, %c0_22] : memref<16x32xf32, #tpu.memory_space<vmem>>, vector<16x32xf32>
      tpu.vector_store %arg10[%c0_21, %c0_22], %40 {strides = array<i32>} : memref<16x32xf32, #tpu.memory_space<vmem>>, vector<16x32xf32>,
    } else {
    }
    %c7_i32 = arith.constant 7 : i32
    %15 = arith.cmpi eq, %arg1, %c7_i32 : i32
    %c0_i32_6 = arith.constant 0 : i32
    %16 = arith.cmpi eq, %arg2, %c0_i32_6 : i32
    %17 = arith.andi %15, %16 : i1
    %18 = arith.extui %17 : i1 to i32
    %c0_i32_7 = arith.constant 0 : i32
    %19 = arith.cmpi ne, %18, %c0_i32_7 : i32
    scf.if %19 {
      %c0 = arith.constant 0 : index
      %c0_8 = arith.constant 0 : index
      %20 = vector.load %arg10[%c0, %c0_8] : memref<16x32xf32, #tpu.memory_space<vmem>>, vector<16x32xf32>
      %c0_9 = arith.constant 0 : index
      %c0_10 = arith.constant 0 : index
      %21 = vector.load %arg9[%c0_9, %c0_10] : memref<16x32xf32, #tpu.memory_space<vmem>>, vector<16x32xf32>
      tpu.vector_store %arg9[%c0_9, %c0_10], %20 {strides = array<i32>} : memref<16x32xf32, #tpu.memory_space<vmem>>, vector<16x32xf32>,
    } else {
    }
    return
  }
  func.func @transform_0(%arg0: i32, %arg1: i32, %arg2: i32, %arg3: memref<8xi32, #tpu.memory_space<smem>>, %arg4: memref<8xi32, #tpu.memory_space<smem>>) -> (i32, i32) {
    %c0_i32 = arith.constant 0 : i32
    %c0_i32_0 = arith.constant 0 : i32
    return %arg0, %c0_i32 : i32, i32
  }
  func.func @transform_1(%arg0: i32, %arg1: i32, %arg2: i32, %arg3: memref<8xi32, #tpu.memory_space<smem>>, %arg4: memref<8xi32, #tpu.memory_space<smem>>) -> (i32, i32) {
    %c0_i32 = arith.constant 0 : i32
    %c0_i32_0 = arith.constant 0 : i32
    return %arg0, %c0_i32 : i32, i32
  }
  func.func @transform_2(%arg0: i32, %arg1: i32, %arg2: i32, %arg3: memref<8xi32, #tpu.memory_space<smem>>, %arg4: memref<8xi32, #tpu.memory_space<smem>>) -> (i32, i32, i32) {
    %c8_i32 = arith.constant 8 : i32
    %0 = arith.muli %arg0, %c8_i32 : i32
    %1 = arith.addi %0, %arg1 : i32
    %2 = arith.index_cast %1 : i32 to index
    %3 = memref.load %arg3[%2] : memref<8xi32, #tpu.memory_space<smem>>
    %4 = arith.muli %3, %arg2 : i32
    %c1_i32 = arith.constant 1 : i32
    %5 = arith.subi %c1_i32, %3 : i32
    %c0_i32 = arith.constant 0 : i32
    %6 = arith.muli %5, %c0_i32 : i32
    %7 = arith.addi %4, %6 : i32
    %8 = arith.index_cast %1 : i32 to index
    %9 = memref.load %arg4[%8] : memref<8xi32, #tpu.memory_space<smem>>
    %c0_i32_0 = arith.constant 0 : i32
    %c0_i32_1 = arith.constant 0 : i32
    return %9, %7, %c0_i32_0 : i32, i32, i32
  }
  func.func @transform_3(%arg0: i32, %arg1: i32, %arg2: i32, %arg3: memref<8xi32, #tpu.memory_space<smem>>, %arg4: memref<8xi32, #tpu.memory_space<smem>>) -> (i32, i32, i32) {
    %c8_i32 = arith.constant 8 : i32
    %0 = arith.muli %arg0, %c8_i32 : i32
    %1 = arith.addi %0, %arg1 : i32
    %2 = arith.index_cast %1 : i32 to index
    %3 = memref.load %arg3[%2] : memref<8xi32, #tpu.memory_space<smem>>
    %4 = arith.muli %3, %arg2 : i32
    %c1_i32 = arith.constant 1 : i32
    %5 = arith.subi %c1_i32, %3 : i32
    %c0_i32 = arith.constant 0 : i32
    %6 = arith.muli %5, %c0_i32 : i32
    %7 = arith.addi %4, %6 : i32
    %8 = arith.index_cast %1 : i32 to index
    %9 = memref.load %arg4[%8] : memref<8xi32, #tpu.memory_space<smem>>
    %c0_i32_0 = arith.constant 0 : i32
    %c0_i32_1 = arith.constant 0 : i32
    return %9, %7, %c0_i32_0 : i32, i32, i32
  }
  func.func @transform_4(%arg0: i32, %arg1: i32, %arg2: i32, %arg3: memref<8xi32, #tpu.memory_space<smem>>, %arg4: memref<8xi32, #tpu.memory_space<smem>>) -> (i32, i32) {
    %c0_i32 = arith.constant 0 : i32
    %c0_i32_0 = arith.constant 0 : i32
    return %arg0, %c0_i32 : i32, i32
  }
}

</mosaic_0001>

<bundles_post_ra>
// kernel: tpu_custom_call.1
= control target key start
LH: loop header
LB: loop body
LE: loop exit
PB: predicated region body
PF: predicated region fallthrough
CT: control target
= control target key end

     0   :  { %s951_s27 = smov [#allocation5]   ;;  %s952_s28 = smov [#allocation6]   ;;  %s1128_s0 = inlined_call_operand.vmem [shape: s32[8], index: 0, kind: input, shape index: {}]   ;;  %s1129_s2 = inlined_call_operand.vmem [shape: f32[16,32], index: 2, kind: input, shape index: {}]   ;;  %s1130_s3 = inlined_call_operand.vmem [shape: f32[16,8], index: 3, kind: input, shape index: {}]   ;;  %s1131_s4 = inlined_call_operand.vmem [shape: f32[8,128,32], index: 4, kind: input, shape index: {}]   ;;  %s1132_s5 = inlined_call_operand.vmem [shape: f32[8,64,32], index: 5, kind: input, shape index: {}]   ;;  %s1133_s6 = inlined_call_operand.hbm [shape: f32[16,32], index: 6, kind: output, shape index: {}]   ;;  %s1134_s1 = inlined_call_operand.vmem [shape: s32[8], index: 1, kind: input, shape index: {}]  }
   0x1   :  { %s12_s23 = sshll.u32 %s1128_s0, 4  ;;  %s17_s26 = sshll.u32 %s1134_s1, 4  ;;  %s13_s23 = int_to_ptr.vmem [resolvable:$true] %s12_s23  ;;  %s18_s26 = int_to_ptr.vmem [resolvable:$true] %s17_s26 }
   0x2   :  { %15 = dma.vmem_to_smem %s13_s23, 16, %s951_s27, [#allocation4] }
   0x3   :  { %20 = dma.vmem_to_smem %s18_s26, 16, %s952_s28, [#allocation4] }
   0x4   :  { %933 = dma.done.wait [#allocation4], 32 }
   0x5   :  { %934 = vsyncadd [#allocation4], 4294967264 }
   0x6   :  { %23 = sfence }
   0x7   :  { %24 = vsyncpa [#allocation8], 0  ;;  %s1000_s29 = smov 0   ;;  %s1002_s30 = smov 0  }
   0x8   :  { %s1004_s7 = smov 0  }
   0x9 LB: > { %s762_s0 = sadd.s32 4294967295, %s949_s7   ;;  %s45_s1 = sadd.s32 1, %s945_s30  ;;  %s949_s7 = sphi %s1004_s7, %s30_s7   ;;  %s945_s30 = sphi %s1002_s30, %s1136_s30   ;;  %s941_s29 = sphi %s1000_s29, %s1135_s29  }
   0xa   : > { %p47_p0 = scmp.ge.s32.totalorder %s45_s1, 8  ;;  %p767_p1 = scmp.ge.s32.totalorder %s949_s7, 1 }
   0xb   : > { %p283_p2 = scmp.lt.s32.totalorder %s949_s7, 9 }
   0xc   : > { %s1138_s1 = smov (%p47_p0, %s45_s1), 0 }
   0xd   : > { %p284_p3 = pnand %p767_p1, %p283_p2 }
   0xe   : > { %s353_s8 = sld [smem:[#allocation6 + %s941_s29]] (!%p284_p3)  ;;  %p390_p4 = scmp.eq.s32.totalorder (!%p284_p3), %s941_s29, 0 }
   0xf   : > { %287 = sbr.rel (%p284_p3) target bundleno = 624 (0x270), region = 36  ;;  %s373_s9 = sld [smem:[#allocation6 + %s941_s29]] (!%p284_p3) }
  0x14   : > { %p355_p5 = scmp.lt.s32.totalorder %s353_s8, 7  ;;  %vm396_vm0 = vcmask (%p390_p4), 261120   ;;  %v953_v0 = vmov (%p390_p4), 0.0  }
  0x15   : > { %p375_p6 = scmp.lt.s32.totalorder %s373_s9, 7  ;;  %395 = sbr.rel (!%p390_p4) target bundleno = 26 (0x1a), region = 40  ;;  %397 = vst.msk [vmem:[#allocation2] sm:$0xff] (%p390_p4), %vm396_vm0, %v953_v0 }
  0x16   : > { %s1140_s8 = smov (!%p355_p5, %s353_s8), 7  ;;  %398 = vst.msk [vmem:[#allocation2 + $0x8] sm:$0xff] (%p390_p4), %vm396_vm0, %v953_v0 }
  0x17   : > { %s1142_s9 = smov (!%p375_p6, %s373_s9), 7  ;;  %s801_s10 = sshll.u32 %s1140_s8, 7 }
  0x18   : > { %s1027_s13 = scalar_lea.vmem %s1131_s4, %s801_s10  ;;  %s802_s14 = sshll.u32 %s1142_s9, 6 }
  0x19   : > { %s1032_s17 = scalar_lea.vmem %s1132_s5, %s802_s14 }
  0x1a PF: > { %v404_v1 = vlaneseq  ;;  %v406_v2 = vstv %s941_s29  ;;  %v402_v3 = vld [vmem:[%s1130_s3] sm:$0xff]  ;;  %vm410_vm1 = vcmask 64512   ;;  %s422_s20 = sld [smem:[#allocation5 + %s941_s29]]  ;;  %v403_v7 = vld [vmem:[%s1130_s3 + $0x8] sm:$0xff]  ;;  %vm417_vm3 = vcmask 7168  }
  0x1c   : > { %v405_v4 = vand.u32 127, %v404_v1 }
  0x1e   : > { %vm407_vm2 = vcmp.eq.s32.totalorder %v405_v4, %v406_v2 }
  0x1f   : > { %v408_v5 = vsel %vm407_vm2, %v402_v3, 0.0  ;;  %v409_v8 = vsel %vm407_vm2, %v403_v7, 0.0 }
  0x20   : > { %v411_v6 = vsel %vm410_vm1, %v408_v5, 0.0  ;;  %v414_v9 = vsel %vm410_vm1, %v409_v8, 0.0  ;;  %p773_p7 = scmp.le.s32.totalorder %s422_s20, 0 }
  0x21   : > { %412 = vadd.xlane.f32.xlu0 %v411_v6  ;;  %s955_s27 = smov (!%p773_p7), 64  }
  0x29   : > { %415 = vadd.xlane.f32.xlu0 %v414_v9 }
  0x94   : > { %v413_v10 = vpop.xlane.xlu0 %412 }
  0x95   : > { %418 = vst.msk [vmem:[#allocation3] sm:$0xff] %vm417_vm3, %v413_v10 }
  0x99   : > { %426 = sbr.rel (%p773_p7) target bundleno = 610 (0x262), region = 48 }
  0x9c   : > { %v416_v11 = vpop.xlane.xlu0 %415 }
  0x9d   : > { %419 = vst.msk [vmem:[#allocation3 + $0x8] sm:$0xff] %vm417_vm3, %v416_v11 }
  0x9e   : > { %v444_v12 = vld [vmem:[%s1027_s13 + $0x78] sm:$0xff]  ;;  %vm453_vm4 = vcmask 261120   ;;  %v443_v13 = vld [vmem:[%s1027_s13 + $0x70] sm:$0xff]  ;;  %v442_v14 = vld [vmem:[%s1027_s13 + $0x68] sm:$0xff]  ;;  %v954_v30 = vmov 0   ;;  %vm597_vm12 = vcmask 523264  }
  0x9f   : > { %774 = vmatpush.xpose.msk.msra.mxu0 %vm453_vm4, %v444_v12  ;;  %805 = vmatpush.xpose.msk.msra.mxu2 %vm453_vm4, %v444_v12  ;;  %v441_v15 = vld [vmem:[%s1027_s13 + $0x60] sm:$0xff]  ;;  %v440_v16 = vld [vmem:[%s1027_s13 + $0x58] sm:$0xff]  ;;  %v439_v17 = vld [vmem:[%s1027_s13 + $0x50] sm:$0xff] }
  0xa0   : > { %v438_v18 = vld [vmem:[%s1027_s13 + $0x48] sm:$0xff]  ;;  %v437_v19 = vld [vmem:[%s1027_s13 + $0x40] sm:$0xff]  ;;  %v436_v20 = vld [vmem:[%s1027_s13 + $0x38] sm:$0xff]  ;;  %859 = vset.pattern.permute.xlu0 %v954_v30  ;;  %860 = vset.pattern.permute.xlu1 %v954_v30 }
  0xa1   : > { %v435_v21 = vld [vmem:[%s1027_s13 + $0x30] sm:$0xff]  ;;  %v434_v22 = vld [vmem:[%s1027_s13 + $0x28] sm:$0xff]  ;;  %v433_v23 = vld [vmem:[%s1027_s13 + $0x20] sm:$0xff] }
  0xa2   : > { %v432_v24 = vld [vmem:[%s1027_s13 + $0x18] sm:$0xff]  ;;  %v431_v25 = vld [vmem:[%s1027_s13 + $0x10] sm:$0xff]  ;;  %v430_v26 = vld [vmem:[%s1027_s13 + $0x8] sm:$0xff] }
  0xa3   : > { %775 = vmatpush.xpose.msk.msra.mxu0 %vm453_vm4, %v443_v13  ;;  %806 = vmatpush.xpose.msk.msra.mxu2 %vm453_vm4, %v443_v13  ;;  %v429_v27 = vld [vmem:[%s1027_s13] sm:$0xff]  ;;  %v428_v29 = vld [vmem:[%s1129_s2 + $0x8] sm:$0xff]  ;;  %v452_v32 = vld [vmem:[%s1032_s17 + $0x38] sm:$0xff] }
  0xa4   : > { %v427_v28 = vld [vmem:[%s1129_s2] sm:$0xff]  ;;  %v451_v33 = vld [vmem:[%s1032_s17 + $0x30] sm:$0xff]  ;;  %612 = vmatpush.msra.mxu1 %v452_v32  ;;  %v450_v34 = vld [vmem:[%s1032_s17 + $0x28] sm:$0xff] }
  0xa5   : > { %v581_v36 = vld [vmem:[#allocation3] sm:$0xff]  ;;  %v582_v37 = vld [vmem:[#allocation3 + $0x8] sm:$0xff]  ;;  %v449_v41 = vld [vmem:[%s1032_s17 + $0x20] sm:$0xff] }
  0xa6   : > { %613 = vmatpush.msra.mxu1 %v451_v33  ;;  %v448_v42 = vld [vmem:[%s1032_s17 + $0x18] sm:$0xff]  ;;  %v447_v44 = vld [vmem:[%s1032_s17 + $0x10] sm:$0xff]  ;;  %v446_v46 = vld [vmem:[%s1032_s17 + $0x8] sm:$0xff] }
  0xa7   : > { %776 = vmatpush.xpose.msk.msra.mxu0 %vm453_vm4, %v442_v14  ;;  %807 = vmatpush.xpose.msk.msra.mxu2 %vm453_vm4, %v442_v14  ;;  %v445_v47 = vld [vmem:[%s1032_s17] sm:$0xff] }
  0xa8   : > { %614 = vmatpush.msra.mxu1 %v450_v34 }
  0xaa   : > { %615 = vmatpush.msra.mxu1 %v449_v41 }
  0xab   : > { %777 = vmatpush.xpose.msk.msra.mxu0 %vm453_vm4, %v441_v15  ;;  %808 = vmatpush.xpose.msk.msra.mxu2 %vm453_vm4, %v441_v15  ;;  %v595_v15 = vld [vmem:[#allocation2] sm:$0xff] }
  0xac   : > { %616 = vmatpush.msra.mxu1 %v448_v42 }
  0xae   : > { %617 = vmatpush.msra.mxu1 %v447_v44 }
  0xaf   : > { %778 = vmatpush.xpose.msk.msra.mxu0 %vm453_vm4, %v440_v16  ;;  %809 = vmatpush.xpose.msk.msra.mxu2 %vm453_vm4, %v440_v16 }
  0xb0   : > { %618 = vmatpush.msra.mxu1 %v446_v46 }
  0xb2   : > { %619 = vmatpush.msra.mxu1 %v445_v47 }
  0xb3   : > { %779 = vmatpush.xpose.msk.msra.mxu0 %vm453_vm4, %v439_v17  ;;  %810 = vmatpush.xpose.msk.msra.mxu2 %vm453_vm4, %v439_v17 }
  0xb7   : > { %780 = vmatpush.xpose.msk.msra.mxu0 %vm453_vm4, %v438_v18  ;;  %811 = vmatpush.xpose.msk.msra.mxu2 %vm453_vm4, %v438_v18  ;;  %v596_v18 = vld [vmem:[#allocation2 + $0x8] sm:$0xff] }
  0xbb   : > { %781 = vmatpush.xpose.msk.msra.mxu0 %vm453_vm4, %v437_v19  ;;  %812 = vmatpush.xpose.msk.msra.mxu2 %vm453_vm4, %v437_v19 }
  0xbf   : > { %782 = vmatpush.xpose.msk.msra.mxu0 %vm453_vm4, %v436_v20  ;;  %813 = vmatpush.xpose.msk.msra.mxu2 %vm453_vm4, %v436_v20 }
  0xc3   : > { %783 = vmatpush.xpose.msk.msra.mxu0 %vm453_vm4, %v435_v21  ;;  %814 = vmatpush.xpose.msk.msra.mxu2 %vm453_vm4, %v435_v21 }
  0xc7   : > { %784 = vmatpush.xpose.msk.msra.mxu0 %vm453_vm4, %v434_v22  ;;  %815 = vmatpush.xpose.msk.msra.mxu2 %vm453_vm4, %v434_v22 }
  0xcb   : > { %785 = vmatpush.xpose.msk.msra.mxu0 %vm453_vm4, %v433_v23  ;;  %816 = vmatpush.xpose.msk.msra.mxu2 %vm453_vm4, %v433_v23 }
  0xcf   : > { %786 = vmatpush.xpose.msk.msra.mxu0 %vm453_vm4, %v432_v24  ;;  %817 = vmatpush.xpose.msk.msra.mxu2 %vm453_vm4, %v432_v24 }
  0xd3   : > { %787 = vmatpush.xpose.msk.msra.mxu0 %vm453_vm4, %v431_v25  ;;  %818 = vmatpush.xpose.msk.msra.mxu2 %vm453_vm4, %v431_v25 }
  0xd7   : > { %788 = vmatpush.xpose.msk.msra.mxu0 %vm453_vm4, %v430_v26  ;;  %819 = vmatpush.xpose.msk.msra.mxu2 %vm453_vm4, %v430_v26 }
  0xdb   : > { %789 = vmatpush.xpose.msk.msra.mxu0 %vm453_vm4, %v429_v27  ;;  %820 = vmatpush.xpose.msk.msra.mxu2 %vm453_vm4, %v429_v27 }
  0xde   : > { %790 = vmatmul.msk.f32.vlgmr.msra.gmra.mxu0 %vm453_vm4, %v427_v28  ;;  %791 = vmatmul.msk.f32.vlgmr.msra.gmra.mxu2 %vm453_vm4, %v428_v29 }
 0x15b   : > { %v525_v31 = vpop.f32.mrf.mxu0 }
 0x15c   : > { %573 = vrot.lane.b32.xlu0 %v525_v31, %s955_s27  ;;  %v792_v38 = vmul.f32 -1.442695, %v525_v31 }
 0x15e   : > { %861 = vpow2.f32 %v792_v38 }
 0x161   : > { %v1101_v35 = vpop.f32.mrf.mxu2 }
 0x162   : > { %575 = vrot.lane.b32.xlu1 %v1101_v35, %s955_s27  ;;  %v793_v39 = vmul.f32 -1.442695, %v1101_v35 }
 0x164   : > { %585 = vperm.xlu0 %859, %v581_v36   ;;  %v862_v40 = vpop.eup %861  ;;  %863 = vpow2.f32 %v793_v39 }
 0x165   : > { %v537_v43 = vadd.f32 1.0, %v862_v40 }
 0x167   : > { %865 = vrcp.f32 %v537_v43  ;;  %v550_v57 = vand.u32 2147483648, %v537_v43  ;;  %vm544_vm6 = vweird.f32 %v537_v43  ;;  %v548_v58 = vand.u32 2147483647, %v537_v43 }
 0x169   : > { %v551_v61 = vor.u32 1.1754944e-38, %v550_v57  ;;  %vm549_vm8 = vcmp.eq.f32.partialorder %v548_v58, 8.507059e+37 }
 0x16a   : > { %590 = vperm.xlu1 %860, %v582_v37   ;;  %v864_v45 = vpop.eup %863 }
 0x16b   : > { %v538_v48 = vadd.f32 1.0, %v864_v45 }
 0x16d   : > { %v866_v49 = vpop.eup %865  ;;  %867 = vrcp.f32 %v538_v48  ;;  %v565_v1 = vand.u32 2147483648, %v538_v48  ;;  %vm559_vm10 = vweird.f32 %v538_v48  ;;  %v563_v3 = vand.u32 2147483647, %v538_v48 }
 0x16e   : > { %v540_v50 = vmul.f32 %v866_v49, %v537_v43  ;;  %vm545_vm5 = vweird.f32 %v866_v49 }
 0x16f   : > { %vm546_vm7 = vmor %vm544_vm6, %vm545_vm5  ;;  %v566_v7 = vor.u32 1.1754944e-38, %v565_v1  ;;  %vm564_vm13 = vcmp.eq.f32.partialorder %v563_v3, 8.507059e+37 }
 0x170   : > { %v541_v51 = vsub.f32 1.0, %v540_v50 }
 0x172   : > { %v542_v53 = vmul.f32 %v866_v49, %v541_v51 }
 0x173   : > { %v868_v52 = vpop.eup %867 }
 0x174   : > { %v555_v54 = vmul.f32 %v868_v52, %v538_v48  ;;  %v543_v55 = vadd.f32 %v866_v49, %v542_v53  ;;  %vm560_vm9 = vweird.f32 %v868_v52 }
 0x175   : > { %vm561_vm11 = vmor %vm559_vm10, %vm560_vm9 }
 0x176   : > { %v556_v56 = vsub.f32 1.0, %v555_v54  ;;  %v547_v59 = vsel %vm546_vm7, %v866_v49, %v543_v55 }
 0x177   : > { %v552_v63 = vsel %vm549_vm8, %v551_v61, %v547_v59 }
 0x178   : > { %v557_v60 = vmul.f32 %v868_v52, %v556_v56  ;;  %v569_v2 = vmul.f32 %v552_v63, %v525_v31 }
 0x17a   : > { %v558_v0 = vadd.f32 %v868_v52, %v557_v60 }
 0x17c   : > { %v562_v5 = vsel %vm561_vm11, %v868_v52, %v558_v0 }
 0x17d   : > { %v567_v10 = vsel %vm564_vm13, %v566_v7, %v562_v5 }
 0x17e   : > { %v570_v11 = vmul.f32 %v567_v10, %v1101_v35 }
 0x1ce   : > { %v574_v62 = vpop.permute.xlu0 %573 }
 0x1cf   : > { %v579_v6 = vmul.f32 %v574_v62, %v569_v2 }
 0x1d4   : > { %v576_v4 = vpop.permute.xlu1 %575 }
 0x1d5   : > { %v580_v13 = vmul.f32 %v576_v4, %v570_v11 }
 0x1d6   : > { %v586_v8 = vpop.permute.xlu0 %585 }
 0x1d7   : > { %v593_v9 = vmul.f32 %v586_v8, %v579_v6 }
 0x1d9   : > { %794 = vmatmul.msk.f32.vlgmr.msra.gmra.mxu1 %vm597_vm12, %v593_v9 }
 0x1dc   : > { %v591_v12 = vpop.permute.xlu1 %590 }
 0x1dd   : > { %v594_v14 = vmul.f32 %v591_v12, %v580_v13 }
 0x1e1   : > { %795 = vmatmul.msk.f32.gmra.mxu1 %vm597_vm12, %v594_v14 }
 0x256   : > { %v621_v16 = vpop.f32.mrf.mxu1 }
 0x257   : > { %v627_v17 = vadd.f32 %v621_v16, %v595_v15 }
 0x259   : > { %629 = vst.msk [vmem:[#allocation2] sm:$0xff] %vm453_vm4, %v627_v17 }
 0x25e   : > { %v624_v19 = vpop.f32.mrf.mxu1 }
 0x25f   : > { %v628_v20 = vadd.f32 %v624_v19, %v596_v18 }
 0x261   : > { %630 = vst.msk [vmem:[#allocation2 + $0x8] sm:$0xff] %vm453_vm4, %v628_v20 }
 0x262 PF: > { %p631_p8 = scmp.eq.s32.totalorder %s941_s29, 7 }
 0x263   : > { %v636_v21 = vld [vmem:[#allocation2] sm:$0xff] (%p631_p8)  ;;  %vm638_vm14 = vcmask (%p631_p8), 261120  }
 0x264   : > { %635 = sbr.rel (!%p631_p8) target bundleno = 618 (0x26a), region = 52  ;;  %639 = vst.msk [vmem:[#allocation7] sm:$0xff] (%p631_p8), %vm638_vm14, %v636_v21 }
 0x268   : > { %v637_v22 = vld [vmem:[#allocation2 + $0x8] sm:$0xff] (%p631_p8) }
 0x269   : > { %640 = vst.msk [vmem:[#allocation7 + $0x8] sm:$0xff] %vm638_vm14, %v637_v22 }
 0x26a PF: > { %p825_p9 = scmp.eq.s32.totalorder %s762_s0, 7  ;;  %s651_s9 = sshll.u32 %s1133_s6, 4  ;;  %s652_s9 = int_to_ptr.hbm [resolvable:$true] %s651_s9 }
 0x26b   : > { %s956_s10 = smov [#allocation7]   ;;  %s957_s12 = smov 128  }
 0x26c   : > { %s649_s11 = sshll.u32 %s956_s10, 4  ;;  %s958_s29 = smov 8   ;;  %s650_s11 = int_to_ptr.vmem [resolvable:$true] %s649_s11 }
 0x26d   : > { %822 = dma.vmem_to_hbm [thread:$0]  (%p825_p9), %s650_s11, 256, %s652_s9, [#allocation8], %s957_s12, %s957_s12, %s958_s29  }
 0x26e   : > { %936 = dma.done.wait (%p825_p9), [#allocation8], 256  }
 0x26f   : > { %938 = vsyncadd (%p825_p9), [#allocation8], 4294967040 }
 0x270 PF: > { %s30_s7 = sadd.s32 1, %s949_s7   ;;  %s1135_s29 = smov %s945_s30 }
 0x271   : > { %p27_p10 = scmp.ge.s32.totalorder %s30_s7, 10   ;;  %s1136_s30 = smov %s1138_s1 }
 0x273   :  { %29 = sbr.rel (!%p27_p10) target bundleno = 9 (0x9), region = 89 }
 0x278   :  { %668 = vsyncpa [#allocation8], 1 }
 0x279   :  { %670 = vsyncpa [#allocation8 + $0x1], 1 }

</bundles_post_ra>
